<compile_context>
chip_gen: v7x
topology: tpu7x:2x2x1
jax: 0.10.0
libtpu: 0.0.40
codegen_flags: <defaults>
</compile_context>

<pallas_src>
from functools import partial

import jax
import jax.numpy as jnp
from jax.experimental import pallas as pl
from jax.experimental.pallas import tpu as pltpu


def _round_up(x, m):
    return (x + m - 1) // m * m


# W1 double-buffer budget (bf16 bytes): keeps 2 * H * tile_n * 2 bounded so the
# kernel fits comfortably inside scoped VMEM on v5e/v6e/v7x.
_W1_DBUF_BUDGET_BYTES = 24 * 1024 * 1024


def _choose_tile_n(h, n_pad):
    """Largest intermediate-dim tile (multiple of 128) dividing n_pad that keeps
    the W1 double buffer within budget."""
    for t in (1024, 512, 256, 128):
        if n_pad % t == 0 and 2 * h * t * 2 <= _W1_DBUF_BUDGET_BYTES:
            return t
    return 128


def prepare_classifier_weights(w1, b1, w2, b2):
    """One-time weight formatting (bf16 cast + padding).

    Call ONCE and reuse the returned arrays across forward calls; doing this
    per call would roughly triple the dominant W1 HBM traffic.

    w1: [H, H]  b1: [H]   first Linear, stored [in, out]
    w2: [H, L]  b2: [L]   second Linear, stored [in, out]
    """
    H = w1.shape[0]
    L = w2.shape[1]
    # Pad the intermediate dim (W1 cols / W2 rows / b1) and the label dim to
    # lane multiples.  Padded W2 rows are zero, so padded hidden units (ReLU of
    # whatever) contribute nothing to the logits.
    n_pad = _round_up(max(H, 128), 128)
    l_pad = _round_up(max(L, 128), 128)

    w1_p = jnp.pad(w1.astype(jnp.bfloat16), ((0, 0), (0, n_pad - H)))          # [H, N_pad] bf16
    b1_p = jnp.pad(b1.reshape(1, H).astype(jnp.float32),
                   ((0, 0), (0, n_pad - H)))                                    # [1, N_pad] f32
    w2_p = jnp.pad(w2.astype(jnp.bfloat16),
                   ((0, n_pad - H), (0, l_pad - L)))                            # [N_pad, L_pad] bf16
    b2_p = jnp.pad(b2.reshape(1, L).astype(jnp.float32),
                   ((0, 0), (0, l_pad - L)))                                    # [1, L_pad] f32
    return w1_p, b1_p, w2_p, b2_p


def _classifier_head_kernel(x_ref, w1_ref, b1_ref, w2_ref, b2_ref, o_ref):
    k = pl.program_id(0)
    tile_n = w1_ref.shape[1]

    # Output block is resident across the reduction axis (constant out_spec
    # index map) -> use it directly as the f32 accumulator.
    @pl.when(k == 0)
    def _():
        o_ref[...] = jnp.zeros_like(o_ref)

    # Linear(H, H) tile: bf16 MXU matmul, f32 accumulation; bias added in f32
    # from the resident [1, N_pad] b1 (sliced, no per-step DMA).
    h = jnp.dot(x_ref[...], w1_ref[...], preferred_element_type=jnp.float32)
    start = pl.multiple_of(k * tile_n, tile_n)
    h = h + b1_ref[:, pl.ds(start, tile_n)]

    # ReLU
    h = jnp.maximum(h, 0.0)

    # TODO(synk): Dropout(0.2) is identity here (inference/eval mode); a
    # training-mode stochastic mask (pltpu.prng_seed / prng_random_bits + 1/(1-p)
    # scaling) is not implemented.

    # Linear(H, num_labels) partial sum for this tile of the intermediate dim.
    o_ref[...] += jnp.dot(h.astype(jnp.bfloat16), w2_ref[...],
                          preferred_element_type=jnp.float32)

    @pl.when(k == pl.num_programs(0) - 1)
    def _():
        o_ref[...] = o_ref[...] + b2_ref[...]


@partial(jax.jit, static_argnames=("num_labels",))
def multilabel_classifier_head(hidden_states, w1_p, b1_p, w2_p, b2_p, *, num_labels):
    """Classifier head of MultiLabelClassifier.

    hidden_states: [B, S, H]  last-layer hidden states from the peft model
    w1_p/b1_p/w2_p/b2_p: pre-formatted weights from prepare_classifier_weights
    returns logits [B, num_labels] float32
    """
    B, S, H = hidden_states.shape
    n_pad = w1_p.shape[1]
    l_pad = w2_p.shape[1]

    # Last-token select (matches `[:, -1, :]`).  Tiny wrapper slice; weights
    # are the dominant HBM stream.
    x = hidden_states[:, -1, :].astype(jnp.bfloat16)

    # Pad batch to a multiple of 16 (bf16 packs two rows per sublane).
    b_pad = _round_up(max(B, 16), 16)
    x_p = jnp.pad(x, ((0, b_pad - B), (0, 0)))                         # [B_pad, H] bf16

    tile_n = _choose_tile_n(H, n_pad)
    n_tiles = n_pad // tile_n

    out = pl.pallas_call(
        _classifier_head_kernel,
        out_shape=jax.ShapeDtypeStruct((b_pad, l_pad), jnp.float32),
        grid_spec=pltpu.PrefetchScalarGridSpec(
            num_scalar_prefetch=0,
            grid=(n_tiles,),
            in_specs=[
                pl.BlockSpec((b_pad, H), lambda k: (0, 0)),        # x: VMEM-resident
                pl.BlockSpec((H, tile_n), lambda k: (0, k)),       # W1 tile (streamed)
                pl.BlockSpec((1, n_pad), lambda k: (0, 0)),        # b1: resident f32
                pl.BlockSpec((tile_n, l_pad), lambda k: (k, 0)),   # W2 tile (streamed)
                pl.BlockSpec((1, l_pad), lambda k: (0, 0)),        # b2: resident f32
            ],
            out_specs=pl.BlockSpec((b_pad, l_pad), lambda k: (0, 0)),
        ),
        compiler_params=pltpu.CompilerParams(
            dimension_semantics=("arbitrary",),        # reduction over the N tiles
            vmem_limit_bytes=48 * 1024 * 1024,         # room for tile_n=1024 on v5e too
        ),
    )(x_p, w1_p, b1_p, w2_p, b2_p)

    return out[:B, :num_labels]


def _reference(hidden_states, w1, b1, w2, b2):
    # PyTorch-equivalent f32 math (eval mode: dropout is identity).
    x = hidden_states[:, -1, :].astype(jnp.float32)
    h = jnp.maximum(x @ w1 + b1, 0.0)
    return h @ w2 + b2


if __name__ == "__main__":
    # Small shapes consistent with the module's forward.
    B, S, H, L = 2, 8, 32, 8   # batch, seq, hidden_size, num_labels

    key = jax.random.PRNGKey(0)
    k_hid, k_w1, k_b1, k_w2, k_b2 = jax.random.split(key, 5)

    # Synthetic stand-in for peft(...).hidden_states[-1]
    # TODO(synk): the peft transformer backbone is an external model and is not
    # reimplemented here; its output hidden states are supplied as an input.
    hidden_states = jax.random.normal(k_hid, (B, S, H), dtype=jnp.float32)

    # nn.Linear(H,H) and nn.Linear(H,L) parameters, stored pre-transposed [in, out].
    w1 = jax.random.normal(k_w1, (H, H), dtype=jnp.float32) * (1.0 / jnp.sqrt(H))
    b1 = jax.random.normal(k_b1, (H,), dtype=jnp.float32) * 0.01
    w2 = jax.random.normal(k_w2, (H, L), dtype=jnp.float32) * (1.0 / jnp.sqrt(H))
    b2 = jax.random.normal(k_b2, (L,), dtype=jnp.float32) * 0.01

    # One-time weight formatting (kept out of the per-call path on purpose).
    w1_p, b1_p, w2_p, b2_p = prepare_classifier_weights(w1, b1, w2, b2)
    w1_p, b1_p, w2_p, b2_p = jax.block_until_ready((w1_p, b1_p, w2_p, b2_p))

    logits = multilabel_classifier_head(hidden_states, w1_p, b1_p, w2_p, b2_p,
                                        num_labels=L)
    logits = jax.block_until_ready(logits)

    ref = _reference(hidden_states, w1, b1, w2, b2)
    assert logits.shape == (B, L) and logits.dtype == jnp.float32
    # bf16 MXU inputs (f32 accumulation) vs PyTorch's pure-f32 .float() math:
    # tolerance loosened accordingly.
    assert jnp.allclose(logits, ref, atol=5e-2, rtol=5e-2), (
        float(jnp.max(jnp.abs(logits - ref))))

    print("KERNEL_OK")
</pallas_src>

<mosaic_0001>
module attributes {stable_mosaic.version = 11 : i64} {
  func.func @_classifier_head_kernel(%arg0: i32, %arg1: memref<16x32xbf16, #tpu.memory_space<vmem>>, %arg2: memref<32x128xbf16, #tpu.memory_space<vmem>>, %arg3: memref<1x128xf32, #tpu.memory_space<vmem>>, %arg4: memref<128x128xbf16, #tpu.memory_space<vmem>>, %arg5: memref<1x128xf32, #tpu.memory_space<vmem>>, %arg6: memref<16x128xf32, #tpu.memory_space<vmem>>) attributes {dimension_semantics = [#tpu.dimension_semantics<arbitrary>], iteration_bounds = array<i64: 1>, scalar_prefetch = 0 : i64, scratch_operands = 0 : i64, tpu.core_type = #tpu.core_type<tc>, window_params = [{pipeline_mode = #tpu.pipeline_mode<synchronous>, transform_indices = @transform_0, window_bounds = array<i64: 16, 32>}, {transform_indices = @transform_1, window_bounds = array<i64: 32, 128>}, {pipeline_mode = #tpu.pipeline_mode<synchronous>, transform_indices = @transform_2, window_bounds = array<i64: 1, 128>}, {transform_indices = @transform_3, window_bounds = array<i64: 128, 128>}, {pipeline_mode = #tpu.pipeline_mode<synchronous>, transform_indices = @transform_4, window_bounds = array<i64: 1, 128>}, {pipeline_mode = #tpu.pipeline_mode<synchronous>, transform_indices = @transform_5, window_bounds = array<i64: 16, 128>}]} {
    %c0_i32 = arith.constant 0 : i32
    %0 = arith.cmpi eq, %arg0, %c0_i32 : i32
    %1 = arith.extui %0 : i1 to i32
    %c0_i32_0 = arith.constant 0 : i32
    %2 = arith.cmpi ne, %1, %c0_i32_0 : i32
    scf.if %2 {
      %cst_15 = arith.constant 0.000000e+00 : f32
      %23 = vector.broadcast %cst_15 : f32 to vector<16x128xf32>
      %c0_16 = arith.constant 0 : index
      %c0_17 = arith.constant 0 : index
      %24 = vector.load %arg6[%c0_16, %c0_17] : memref<16x128xf32, #tpu.memory_space<vmem>>, vector<16x128xf32>
      tpu.vector_store %arg6[%c0_16, %c0_17], %23 {strides = array<i32>} : memref<16x128xf32, #tpu.memory_space<vmem>>, vector<16x128xf32>,
    } else {
    }
    %c0 = arith.constant 0 : index
    %c0_1 = arith.constant 0 : index
    %3 = vector.load %arg1[%c0, %c0_1] : memref<16x32xbf16, #tpu.memory_space<vmem>>, vector<16x32xbf16>
    %c0_2 = arith.constant 0 : index
    %c0_3 = arith.constant 0 : index
    %4 = vector.load %arg2[%c0_2, %c0_3] : memref<32x128xbf16, #tpu.memory_space<vmem>>, vector<32x128xbf16>
    %cst = arith.constant dense<0.000000e+00> : vector<16x128xf32>
    %5 = tpu.matmul %3, %4, %cst {dimension_numbers = #tpu.dot_dimension_numbers<[1], [0], [0], [1], [0, 0, 1, 1], [], []>} : vector<16x32xbf16>, vector<32x128xbf16>, vector<16x128xf32> -> vector<16x128xf32>
    %c128_i32 = arith.constant 128 : i32
    %6 = arith.muli %arg0, %c128_i32 : i32
    %7 = tpu.assume_multiple %6, 128 : i32
    %c0_4 = arith.constant 0 : index
    %8 = arith.index_cast %7 : i32 to index
    %9 = vector.load %arg3[%c0_4, %8] : memref<1x128xf32, #tpu.memory_space<vmem>>, vector<1x128xf32>
    %10 = vector.broadcast %9 : vector<1x128xf32> to vector<16x128xf32>
    %11 = arith.addf %5, %10 : vector<16x128xf32>
    %cst_5 = arith.constant 0.000000e+00 : f32
    %12 = vector.broadcast %cst_5 : f32 to vector<16x128xf32>
    %13 = arith.maximumf %11, %12 : vector<16x128xf32>
    %c0_6 = arith.constant 0 : index
    %c0_7 = arith.constant 0 : index
    %14 = vector.load %arg6[%c0_6, %c0_7] : memref<16x128xf32, #tpu.memory_space<vmem>>, vector<16x128xf32>
    %15 = arith.truncf %13 : vector<16x128xf32> to vector<16x128xbf16>
    %c0_8 = arith.constant 0 : index
    %c0_9 = arith.constant 0 : index
    %16 = vector.load %arg4[%c0_8, %c0_9] : memref<128x128xbf16, #tpu.memory_space<vmem>>, vector<128x128xbf16>
    %cst_10 = arith.constant dense<0.000000e+00> : vector<16x128xf32>
    %17 = tpu.matmul %15, %16, %cst_10 {dimension_numbers = #tpu.dot_dimension_numbers<[1], [0], [0], [1], [0, 0, 1, 1], [], []>} : vector<16x128xbf16>, vector<128x128xbf16>, vector<16x128xf32> -> vector<16x128xf32>
    %18 = arith.addf %14, %17 : vector<16x128xf32>
    %c0_11 = arith.constant 0 : index
    %c0_12 = arith.constant 0 : index
    %19 = vector.load %arg6[%c0_11, %c0_12] : memref<16x128xf32, #tpu.memory_space<vmem>>, vector<16x128xf32>
    tpu.vector_store %arg6[%c0_11, %c0_12], %18 {strides = array<i32>} : memref<16x128xf32, #tpu.memory_space<vmem>>, vector<16x128xf32>,
    %c0_i32_13 = arith.constant 0 : i32
    %20 = arith.cmpi eq, %arg0, %c0_i32_13 : i32
    %21 = arith.extui %20 : i1 to i32
    %c0_i32_14 = arith.constant 0 : i32
    %22 = arith.cmpi ne, %21, %c0_i32_14 : i32
    scf.if %22 {
      %c0_15 = arith.constant 0 : index
      %c0_16 = arith.constant 0 : index
      %23 = vector.load %arg6[%c0_15, %c0_16] : memref<16x128xf32, #tpu.memory_space<vmem>>, vector<16x128xf32>
      %c0_17 = arith.constant 0 : index
      %c0_18 = arith.constant 0 : index
      %24 = vector.load %arg5[%c0_17, %c0_18] : memref<1x128xf32, #tpu.memory_space<vmem>>, vector<1x128xf32>
      %25 = vector.broadcast %24 : vector<1x128xf32> to vector<16x128xf32>
      %26 = arith.addf %23, %25 : vector<16x128xf32>
      %c0_19 = arith.constant 0 : index
      %c0_20 = arith.constant 0 : index
      %27 = vector.load %arg6[%c0_19, %c0_20] : memref<16x128xf32, #tpu.memory_space<vmem>>, vector<16x128xf32>
      tpu.vector_store %arg6[%c0_19, %c0_20], %26 {strides = array<i32>} : memref<16x128xf32, #tpu.memory_space<vmem>>, vector<16x128xf32>,
    } else {
    }
    return
  }
  func.func @transform_0(%arg0: i32) -> (i32, i32) {
    %c0_i32 = arith.constant 0 : i32
    %c0_i32_0 = arith.constant 0 : i32
    %c0_i32_1 = arith.constant 0 : i32
    return %c0_i32, %c0_i32_0 : i32, i32
  }
  func.func @transform_1(%arg0: i32) -> (i32, i32) {
    %c0_i32 = arith.constant 0 : i32
    %c0_i32_0 = arith.constant 0 : i32
    return %c0_i32, %arg0 : i32, i32
  }
  func.func @transform_2(%arg0: i32) -> (i32, i32) {
    %c0_i32 = arith.constant 0 : i32
    %c0_i32_0 = arith.constant 0 : i32
    %c0_i32_1 = arith.constant 0 : i32
    return %c0_i32, %c0_i32_0 : i32, i32
  }
  func.func @transform_3(%arg0: i32) -> (i32, i32) {
    %c0_i32 = arith.constant 0 : i32
    %c0_i32_0 = arith.constant 0 : i32
    return %arg0, %c0_i32 : i32, i32
  }
  func.func @transform_4(%arg0: i32) -> (i32, i32) {
    %c0_i32 = arith.constant 0 : i32
    %c0_i32_0 = arith.constant 0 : i32
    %c0_i32_1 = arith.constant 0 : i32
    return %c0_i32, %c0_i32_0 : i32, i32
  }
  func.func @transform_5(%arg0: i32) -> (i32, i32) {
    %c0_i32 = arith.constant 0 : i32
    %c0_i32_0 = arith.constant 0 : i32
    %c0_i32_1 = arith.constant 0 : i32
    return %c0_i32, %c0_i32_0 : i32, i32
  }
}

</mosaic_0001>

<bundles_post_ra>
// kernel: multilabel_classifier_head.1
= control target key start
LH: loop header
LB: loop body
LE: loop exit
PB: predicated region body
PF: predicated region fallthrough
CT: control target
= control target key end

     0   :  { %10 = vsyncpa [#allocation3], 0  ;;  %s350_s18 = smov [#allocation2]   ;;  %s418_s0 = inlined_call_operand.vmem [shape: bf16[16,32], index: 0, kind: input, shape index: {}]   ;;  %s419_s1 = inlined_call_operand.vmem [shape: bf16[32,128], index: 1, kind: input, shape index: {}]   ;;  %s420_s2 = inlined_call_operand.vmem [shape: f32[1,128], index: 2, kind: input, shape index: {}]   ;;  %s421_s3 = inlined_call_operand.hbm [shape: bf16[128,128], index: 3, kind: input, shape index: {}]   ;;  %s422_s4 = inlined_call_operand.vmem [shape: f32[1,128], index: 4, kind: input, shape index: {}]   ;;  %s423_s5 = inlined_call_operand.vmem [shape: f32[16,128], index: 5, kind: output, shape index: {}]  }
   0x1   :  { %s22_s19 = sshll.u32 %s350_s18, 4  ;;  %s326_s22 = scalar_lea.hbm %s421_s3, 1024  ;;  %s23_s19 = int_to_ptr.vmem [resolvable:$true] %s22_s19 }
   0x2   :  { %p327_p0 = scmp.ne.s32.totalorder %s421_s3, %s326_s22  ;;  %p330_p1 = scmp.lt.u32.totalorder %s326_s22, %s421_s3 }
   0x4   :  { %p332_p2 = pnand %p330_p1, %p327_p0 }
   0x6   :  { %335 = shalt.err (!%p332_p2)
}
   0x7   :  { %s336_s27 = scalar_lea.vmem %s23_s19, 1024  ;;  %p341_p4 = scmp.lt.s32.totalorder %s23_s19, %s23_s19 }
   0x8   :  { %p337_p3 = scmp.ne.s32.totalorder %s23_s19, %s336_s27  ;;  %p342_p5 = scmp.lt.s32.totalorder %s336_s27, %s336_s27 }
   0xa   :  { %p343_p6 = por %p342_p5, %p341_p4 }
   0xc   :  { %p344_p7 = pnand %p343_p6, %p337_p3 }
   0xe   :  { %347 = shalt.err (!%p344_p7)
}
   0xf   :  { %s351_s28 = smov 64   ;;  %s352_s29 = smov 4  }
  0x10   :  { %28 = dma.hbm_to_vmem [thread:$0]  %s421_s3, 1024, %s23_s19, [#allocation3], %s351_s28, %s351_s28, %s352_s29  }
  0x11   :  { %348 = dma.done.wait [#allocation3], 1024  }
  0x12   :  { %349 = vsyncadd [#allocation3], 4294966272  ;;  %v353_v0 = vmov 0.0   ;;  %vm354_vm0 = vmmov 0   ;;  %v315_v1 = vld [vmem:[%s419_s1] sm:$0xff]   ;;  %v316_v2 = vld [vmem:[%s419_s1 + $0x8] sm:$0xff]  }
  0x13   :  { %282 = vmatprep.subr.bf16.mxu0 %v353_v0  ;;  %286 = vmatprep.mubr.msk.bf16.mxu0 %vm354_vm0, %v353_v0  ;;  %v318_v3 = vld [vmem:[#allocation2] sm:$0xff]   ;;  %v317_v4 = vld [vmem:[%s418_s0] sm:$0xff]   ;;  %v319_v5 = vld [vmem:[#allocation2 + $0x8] sm:$0xff]   ;;  %vm75_vm1 = vcmask 261120  }
  0x14   :  { %290 = vmatprep.subr.bf16.mxu1 %v353_v0  ;;  %306 = vmatprep.mubr.msk.bf16.mxu1 %vm354_vm0, %v353_v0  ;;  %v320_v6 = vld [vmem:[#allocation2 + $0x10] sm:$0xff]   ;;  %v321_v7 = vld [vmem:[#allocation2 + $0x18] sm:$0xff]   ;;  %v322_v8 = vld [vmem:[#allocation2 + $0x20] sm:$0xff]  }
  0x15   :  { %283 = vmatpush3.bf16.msra.mxu0 %v315_v1  ;;  %291 = vmatpush3.bf16.msra.mxu1 %v318_v3  ;;  %v323_v9 = vld [vmem:[#allocation2 + $0x28] sm:$0xff]   ;;  %v324_v10 = vld [vmem:[#allocation2 + $0x30] sm:$0xff]   ;;  %v325_v11 = vld [vmem:[#allocation2 + $0x38] sm:$0xff]  }
  0x16   :  { %284 = vmatprep.subr.bf16.mxu0 %v353_v0  ;;  %292 = vmatprep.subr.bf16.mxu1 %v353_v0  ;;  %v256_v12 = vld [vmem:[%s420_s2] ss:$0 sm:$0xff] }
  0x17   :  { %v269_v23 = vld [vmem:[%s422_s4] ss:$0 sm:$0xff] }
  0x19   :  { %285 = vmatpush3.bf16.msra.mxu0 %v316_v2  ;;  %293 = vmatpush3.bf16.msra.mxu1 %v319_v5 }
  0x1a   :  { %294 = vmatprep.subr.bf16.mxu1 %v353_v0 }
  0x1c   :  { %287 = vmatmul.mubr.msk.bf16.vlgmr.msra.gmra.mrb[0].mxu0 %vm75_vm1, %v317_v4 }
  0x1d   :  { %295 = vmatpush3.bf16.msra.mxu1 %v320_v6 }
  0x1e   :  { %296 = vmatprep.subr.bf16.mxu1 %v353_v0 }
  0x21   :  { %297 = vmatpush3.bf16.msra.mxu1 %v321_v7 }
  0x22   :  { %298 = vmatprep.subr.bf16.mxu1 %v353_v0 }
  0x25   :  { %299 = vmatpush3.bf16.msra.mxu1 %v322_v8 }
  0x26   :  { %300 = vmatprep.subr.bf16.mxu1 %v353_v0 }
  0x29   :  { %301 = vmatpush3.bf16.msra.mxu1 %v323_v9 }
  0x2a   :  { %302 = vmatprep.subr.bf16.mxu1 %v353_v0 }
  0x2d   :  { %303 = vmatpush3.bf16.msra.mxu1 %v324_v10 }
  0x2e   :  { %304 = vmatprep.subr.bf16.mxu1 %v353_v0 }
  0x31   :  { %305 = vmatpush3.bf16.msra.mxu1 %v325_v11 }
  0xef   :  { %v113_v13 = vpop.f32.mrb[0].mxu0 }
  0xf0   :  { %v114_v14 = vadd.f32 %v256_v12, %v113_v13  ;;  %v288_v15 = vpop.f32.mrb[1].mxu0 }
  0xf1   :  { %v116_v16 = vpop.f32.mrb[2].mxu0 }
  0xf2   :  { %v117_v17 = vadd.f32 %v256_v12, %v116_v16  ;;  %v289_v18 = vpop.f32.mrb[3].mxu0  ;;  %v120_v19 = vmax.f32 %v114_v14, 0.0 }
  0xf4   :  { %v121_v20 = vmax.f32 %v117_v17, 0.0 }
  0xf6   :  { %v124_v21 = vpack.c.bf16 %v121_v20, %v120_v19 }
  0xf8   :  { %307 = vmatmul.mubr.bf16.vlgmr.msra.gmra.mrb[0].mxu1 %v124_v21 }
 0x1cb   :  { %v223_v22 = vpop.f32.mrb[0].mxu1 }
 0x1cc   :  { %v308_v24 = vpop.f32.mrb[1].mxu1  ;;  %v246_v26 = vadd.f32 %v269_v23, %v223_v22 }
 0x1cd   :  { %v226_v25 = vpop.f32.mrb[2].mxu1 }
 0x1ce   :  { %v309_v27 = vpop.f32.mrb[3].mxu1  ;;  %248 = vst [vmem:[%s423_s5] sm:$0xff] %v246_v26  ;;  %v247_v28 = vadd.f32 %v269_v23, %v226_v25 }
 0x1d0   :  { %249 = vst [vmem:[%s423_s5 + $0x8] sm:$0xff] %v247_v28 }
 0x1d1   :  { %254 = vsyncpa [#allocation3], 1 }

</bundles_post_ra>
